<compile_context>
chip_gen: v7x
topology: tpu7x:2x2x1
jax: 0.10.0
libtpu: 0.0.40
codegen_flags: <defaults>
</compile_context>

<pallas_src>
import jax
import jax.numpy as jnp
from jax.experimental import pallas as pl
from jax.experimental.pallas import tpu as pltpu

_LANE = 128


def _trans_kernel(x_ref, o_ref):
    # x_ref block: (TC, TL), o_ref block: (TL, TC)   (batch dim squeezed).
    # NOTE: strip-mining the transpose into 128-wide slices is only worth it
    # if the bundle dump shows vreg spills leaking onto the critical path of
    # this mem-bound kernel; left as a single XLU transpose for now.
    o_ref[...] = x_ref[...].T


def _pick_tile(dim, cap):
    """Full dim if it fits under `cap`, else the largest 128-multiple <= cap.

    A block dim equal to the full array dim is always legal (and maximally
    contiguous); otherwise a fixed 128-aligned tile keeps every store
    lane-dense and the ragged edge is handled by the cdiv grid (only the last
    tile per axis pays a masked store).
    """
    if dim <= cap:
        return dim
    return (cap // _LANE) * _LANE


def _pallas_transpose(x, tc, tl, input_buffers):
    B, C, L = x.shape
    itemsize = jnp.dtype(x.dtype).itemsize
    nl = pl.cdiv(L, tl)
    nc = pl.cdiv(C, tc)

    in_spec_kwargs = {}
    if input_buffers != 2 and hasattr(pl, "Buffered"):
        in_spec_kwargs["pipeline_mode"] = pl.Buffered(input_buffers)

    # Scoped-VMEM budget derived from the actual buffered footprint
    # (in + out tiles) plus generous slack for compiler-internal scratch.
    tile_bytes = tc * tl * itemsize
    vmem_limit = input_buffers * tile_bytes + 2 * tile_bytes + (8 << 20)
    vmem_limit = min(max(vmem_limit, 16 << 20), 32 << 20)

    return pl.pallas_call(
        _trans_kernel,
        out_shape=jax.ShapeDtypeStruct((B, L, C), x.dtype),
        grid_spec=pltpu.PrefetchScalarGridSpec(
            num_scalar_prefetch=0,
            grid=(nl, B, nc),
            in_specs=[
                pl.BlockSpec((None, tc, tl),
                             lambda li, b, ci: (b, ci, li),
                             **in_spec_kwargs),
            ],
            out_specs=pl.BlockSpec((None, tl, tc),
                                   lambda li, b, ci: (b, li, ci)),
        ),
        compiler_params=pltpu.CompilerParams(
            dimension_semantics=("parallel", "parallel", "parallel"),
            vmem_limit_bytes=vmem_limit,
        ),
        cost_estimate=pl.CostEstimate(
            flops=0,
            transcendentals=0,
            bytes_accessed=2 * B * C * L * itemsize,   # pure read + write
        ),
    )(x)


def trans_forward(x, *, force_pallas=False, input_buffers=3):
    """Equivalent of torch `x.permute(0, 2, 1)` for a 3-D tensor (B, C, L)."""
    B, C, L = x.shape
    itemsize = jnp.dtype(x.dtype).itemsize
    total_bytes = B * C * L * itemsize

    # Small / narrow tensors (e.g. the (B, 40, 1) pooled tensor GenoRT's
    # attention actually permutes): per-grid-step (~0.35 us) + launch overhead
    # dominates and XLA usually makes the permute free via layout / fusion.
    if not force_pallas and (total_bytes < (1 << 20) or min(C, L) < _LANE):
        return jnp.transpose(x, (0, 2, 1))

    # Output lane dim: full C whenever it fits (<= 1024) so every written-back
    # output row is one contiguous HBM burst; else a 1024-wide 128-multiple.
    tc = _pick_tile(C, 1024)
    # Input lane dim: 512-class tiles (the measured ~85%-of-roofline regime).
    tl = _pick_tile(L, 512)

    # v7x megacore: make sure at least one parallel grid axis has >= 2
    # iterations for B == 1 inputs so both TensorCores get work.
    if B == 1 and pl.cdiv(L, tl) == 1 and pl.cdiv(C, tc) == 1 and L >= 2 * _LANE:
        tl = ((pl.cdiv(L, 2) + _LANE - 1) // _LANE) * _LANE

    if input_buffers != 2:
        try:
            return _pallas_transpose(x, tc, tl, input_buffers)
        except Exception:
            # pipeline_mode / pl.Buffered unsupported on this JAX build;
            # fall back to the default double-buffered pipeline.
            pass
    return _pallas_transpose(x, tc, tl, 2)


if __name__ == "__main__":
    k0, k1, k2 = jax.random.split(jax.random.PRNGKey(0), 3)

    # 1) Shape implied by the module (attention sits on a 40-channel conv
    #    output); auto-dispatch takes the jnp.transpose fast path.
    x_small = jax.random.normal(k0, (2, 40, 64), dtype=jnp.float32)
    out_small = jax.block_until_ready(trans_forward(x_small))
    assert out_small.shape == (2, 64, 40)
    assert jnp.allclose(out_small, jnp.transpose(x_small, (0, 2, 1))), "small"

    # 2) 128-aligned shape exercising the tiled Pallas path
    #    (tc = C = 256, tl = 512, grid = (2, 2, 1)).
    x_big = jax.random.normal(k1, (2, 256, 640), dtype=jnp.float32)
    out_big = jax.block_until_ready(trans_forward(x_big, force_pallas=True))
    assert out_big.shape == (2, 640, 256)
    assert jnp.allclose(out_big, jnp.transpose(x_big, (0, 2, 1))), "aligned"

    # 3) Non-128-aligned shape exercising the cdiv grid / masked-edge path
    #    (tc = C = 320, tl = 512 with ragged L edge, B = 1).
    x_odd = jax.random.normal(k2, (1, 320, 700), dtype=jnp.float32)
    out_odd = jax.block_until_ready(trans_forward(x_odd, force_pallas=True))
    assert out_odd.shape == (1, 700, 320)
    assert jnp.allclose(out_odd, jnp.transpose(x_odd, (0, 2, 1))), "ragged"

    print("KERNEL_OK")
</pallas_src>

<mosaic_0001>
module attributes {stable_mosaic.version = 11 : i64} {
  func.func @_trans_kernel(%arg0: i32, %arg1: i32, %arg2: i32, %arg3: memref<1x256x512xf32, #tpu.memory_space<vmem>>, %arg4: memref<1x512x256xf32, #tpu.memory_space<vmem>>) attributes {dimension_semantics = [#tpu.dimension_semantics<parallel>, #tpu.dimension_semantics<parallel>, #tpu.dimension_semantics<parallel>], iteration_bounds = array<i64: 2, 2, 1>, scalar_prefetch = 0 : i64, scratch_operands = 0 : i64, tpu.core_type = #tpu.core_type<tc>, window_params = [{transform_indices = @transform_0, window_bounds = array<i64: 1, 256, 512>}, {transform_indices = @transform_1, window_bounds = array<i64: 1, 512, 256>}]} {
    %c0 = arith.constant 0 : index
    %c0_0 = arith.constant 0 : index
    %c0_1 = arith.constant 0 : index
    %0 = vector.load %arg3[%c0, %c0_0, %c0_1] : memref<1x256x512xf32, #tpu.memory_space<vmem>>, vector<1x256x512xf32>
    %1 = vector.shape_cast %0 : vector<1x256x512xf32> to vector<256x512xf32>
    %2 = tpu.transpose %1, [1, 0] : vector<256x512xf32> -> vector<512x256xf32>
    %c0_2 = arith.constant 0 : index
    %c0_3 = arith.constant 0 : index
    %c0_4 = arith.constant 0 : index
    %3 = vector.load %arg4[%c0_2, %c0_3, %c0_4] : memref<1x512x256xf32, #tpu.memory_space<vmem>>, vector<1x512x256xf32>
    %4 = vector.shape_cast %3 : vector<1x512x256xf32> to vector<512x256xf32>
    %5 = vector.shape_cast %2 : vector<512x256xf32> to vector<1x512x256xf32>
    tpu.vector_store %arg4[%c0_2, %c0_3, %c0_4], %5 {strides = array<i32>} : memref<1x512x256xf32, #tpu.memory_space<vmem>>, vector<1x512x256xf32>,
    return
  }
  func.func @transform_0(%arg0: i32, %arg1: i32, %arg2: i32) -> (i32, i32, i32) {
    %c0_i32 = arith.constant 0 : i32
    return %arg1, %arg2, %arg0 : i32, i32, i32
  }
  func.func @transform_1(%arg0: i32, %arg1: i32, %arg2: i32) -> (i32, i32, i32) {
    %c0_i32 = arith.constant 0 : i32
    return %arg1, %arg0, %arg2 : i32, i32, i32
  }
}

</mosaic_0001>

<bundles_post_ra>
// kernel: tpu_custom_call.1
= control target key start
LH: loop header
LB: loop body
LE: loop exit
PB: predicated region body
PF: predicated region fallthrough
CT: control target
= control target key end

     0   :  { %6 = vsyncpa [#allocation3], 0  ;;  %s1551_s0 = inlined_call_operand.hbm [shape: f32[2,256,640], index: 0, kind: input, shape index: {}]   ;;  %s1552_s1 = inlined_call_operand.hbm [shape: f32[2,640,256], index: 1, kind: output, shape index: {}]  }
   0x1   :  { %8 = vsyncpa [#allocation3 + $0x1], 0 }
   0x2   :  { %9 = vsyncpa [#allocation4], 0 }
   0x3   :  { %11 = vsyncpa [#allocation4 + $0x1], 0  ;;  %s1073_s6 = smov 0   ;;  %s1075_s7 = smov 0  }
   0x4   :  { %s1077_s8 = smov 0   ;;  %s1079_s9 = smov 0  }
   0x5   :  { %s1081_s10 = smov 0   ;;  %s1083_s11 = smov 0  }
   0x6   :  { %s1085_s12 = smov 0   ;;  %s1087_s13 = smov 0  }
   0x7 LB: > { %s822_s14 = sadd.s32 4294967295, %s1055_s13   ;;  %s823_s15 = sadd.s32 4294967294, %s1055_s13   ;;  %s1055_s13 = sphi %s1087_s13, %s17_s13   ;;  %s1051_s12 = sphi %s1085_s12, %s1564_s12   ;;  %s1047_s11 = sphi %s1083_s11, %s1563_s11   ;;  %s1043_s10 = sphi %s1081_s10, %s1562_s10   ;;  %s1039_s9 = sphi %s1079_s9, %s1561_s9   ;;  %s1035_s8 = sphi %s1077_s8, %s1560_s8   ;;  %s1031_s7 = sphi %s1075_s7, %s1559_s7   ;;  %s1027_s6 = sphi %s1073_s6, %s1558_s6  }
   0x8   : > { %s32_s16 = sadd.s32 1, %s1047_s11  ;;  %s36_s17 = sadd.s32 1, %s1051_s12 }
   0x9   : > { %p34_p0 = scmp.ge.s32.totalorder %s32_s16, 2  ;;  %p54_p1 = scmp.ne.s32.totalorder %s1035_s8, %s1031_s7 }
   0xa   : > { %p55_p2 = scmp.eq.s32.totalorder %s1055_s13, 0  ;;  %p60_p5 = scmp.ne.s32.totalorder %s1031_s7, %s1027_s6 }
   0xb   : > { %s1566_s16 = smov (%p34_p0, %s32_s16), 0  ;;  %s1568_s17 = smov (!%p34_p0, %s36_s17), %s1051_s12 }
   0xc   : > { %s40_s18 = ssub.s32 %s1047_s11, %s1566_s16  ;;  %p1125_p3 = por %p55_p2, %p54_p1 }
   0xd   : > { %p38_p4 = scmp.ge.s32.totalorder %s1568_s17, 2  ;;  %p61_p6 = scmp.eq.s32.totalorder %s822_s14, 0 }
   0xe   : > { %p88_p7 = scmp.eq.s32.totalorder %s822_s14, 3  ;;  %p94_p10 = scmp.eq.s32.totalorder %s823_s15, 3 }
   0xf   : > { %s1570_s17 = smov (%p38_p4, %s1568_s17), 0  ;;  %p1133_p8 = por %p61_p6, %p60_p5 }
  0x10   : > { %p1137_p9 = por %p88_p7, %p54_p1  ;;  %s43_s22 = ssub.s32 %s1051_s12, %s1570_s17 }
  0x11   : > { %s44_s23 = sor.u32 %s43_s22, %s40_s18  ;;  %s47_s24 = sadd.s32 1, %s1035_s8 }
  0x12   : > { %p45_p11 = scmp.eq.s32.totalorder %s44_s23, 0  ;;  %p1144_p12 = por %p94_p10, %p60_p5 }
  0x13   : > { %p825_p13 = scmp.ge.s32.totalorder %s1055_s13, 4 }
  0x14   : > { %s1556_s25 = scalar_select %p1144_p12, 1, 0 }
  0x15   : > { %s1149_s26 = scalar_select %p45_p11, %s1035_s8, %s47_s24  }
  0x16   : > { %110 = sbr.rel (%p825_p13) target bundleno = 66 (0x42), region = 16 }
  0x1d   : > { %113 = sbr.rel (!%p1125_p3) target bundleno = 66 (0x42), region = 20  ;;  %s114_s27 = sand.u32 (%p1125_p3), 1, %s1035_s8  }
  0x1e   : > { %s827_s28 = sshll.u32 (%p1125_p3), %s1051_s12, 2  ;;  %s826_s29 = sshll.u32 (%p1125_p3), %s114_s27, 10 }
  0x1f   : > { %s121_s30 = ssub.s32 (%p1125_p3), 5, %s827_s28  ;;  %s1162_s4 = scalar_lea.sflag (%p1125_p3), [#allocation3], %s114_s27 }
  0x20   : > { %p122_p0 = scmp.lt.s32.totalorder (%p1125_p3), %s121_s30, 4  ;;  %s118_s5 = scalar_lea.vmem (%p1125_p3), [#allocation2], %s826_s29 }
  0x24   : > { %s1572_s30 = smov (!%p122_p0, %s121_s30), 4 }
  0x25   : > { %s1159_s2 = sshll.u32 %s1572_s30, 12 }
  0x26   : > { %s126_s3 = ssub.s32 16384, %s1159_s2 }
  0x27   : > { %127 = vsyncadd %s1162_s4, %s126_s3  ;;  %p829_p1 = scmp.ne.s32.totalorder %s1159_s2, 0  ;;  %s852_s14 = smul.u32 160, %s1047_s11 }
  0x28   : > { %s831_s15 = sshll.u32 %s1572_s30, 3  ;;  %s137_s18 = sshll.u32 %s118_s5, 4  ;;  %s1168_s18 = int_to_ptr.vmem [resolvable:$true] %s137_s18 }
  0x29   : > { %s132_s19 = sadd.s32 %s852_s14, %s827_s28  ;;  %s933_s28 = scalar_lea.hbm %s1551_s0, 40960 }
  0x2a   : > { %s830_s22 = sshll.u32 %s132_s19, 7 }
  0x2b   : > { %s1173_s27 = scalar_lea.hbm %s1551_s0, %s830_s22 }
  0x2c   : > { %s929_s29 = scalar_lea.hbm %s1173_s27, %s1159_s2  ;;  %p934_p5 = scmp.lt.u32.totalorder %s1173_s27, %s1551_s0 }
  0x2d   : > { %p930_p2 = scmp.ne.s32.totalorder %s1173_s27, %s929_s29  ;;  %p935_p6 = scmp.lt.u32.totalorder %s933_s28, %s929_s29 }
  0x2e   : > { %p937_p10 = scmp.lt.u32.totalorder %s929_s29, %s1173_s27 }
  0x2f   : > { %p931_p3 = pnand %p930_p2, %p829_p1  ;;  %p936_p7 = por %p935_p6, %p934_p5 }
  0x31   : > { %p932_p4 = pneg %p931_p3  ;;  %p938_p11 = por %p937_p10, %p936_p7 }
  0x33   : > { %p939_p13 = pnand %p938_p11, %p932_p4 }
  0x35   : > { %942 = shalt.err (!%p939_p13)
}
  0x36   : > { %s943_s22 = scalar_lea.vmem %s1168_s18, %s1159_s2  ;;  %s1057_s23 = smov [#allocation2]  }
  0x37   : > { %p944_p0 = scmp.ne.s32.totalorder %s1168_s18, %s943_s22  ;;  %s947_s24 = sshll.u32 %s1057_s23, 4  ;;  %s948_s24 = int_to_ptr.vmem [resolvable:$false] %s947_s24 }
  0x38   : > { %s949_s3 = scalar_lea.vmem %s948_s24, 32768  ;;  %p950_p12 = scmp.lt.s32.totalorder %s1168_s18, %s948_s24 }
  0x39   : > { %p945_p2 = pnand %p944_p0, %p829_p1  ;;  %p951_p5 = scmp.lt.s32.totalorder %s949_s3, %s943_s22 }
  0x3b   : > { %p946_p3 = pneg %p945_p2  ;;  %p952_p6 = por %p951_p5, %p950_p12 }
  0x3d   : > { %p953_p7 = pnand %p952_p6, %p946_p3 }
  0x3f   : > { %956 = shalt.err (!%p953_p7)
}
  0x40   : > { %s1058_s29 = smov 640   ;;  %s1059_s5 = smov 512  }
  0x41   : > { %143 = dma.hbm_to_vmem [thread:$0]  (%p829_p1), %s1173_s27, %s1159_s2, %s1168_s18, %s1162_s4, %s1058_s29, %s1059_s5, %s831_s15  }
  0x42 PF: > { %p834_p4 = scmp.ge.s32.totalorder %s1055_s13, 1  ;;  %p145_p10 = scmp.lt.s32.totalorder %s1055_s13, 5 }
  0x44   : > { %p146_p12 = pnand %p834_p4, %p145_p10 }
  0x45   : > { %s1205_s28 = sand.u32 (!%p146_p12), 1, %s1031_s7  }
  0x46   : > { %149 = sbr.rel (%p146_p12) target bundleno = 491 (0x1eb), region = 24  ;;  %s835_s14 = sshll.u32 (!%p146_p12), %s1205_s28, 10 }
  0x47   : > { %s152_s19 = scalar_lea.sflag (!%p146_p12), [#allocation3], %s1205_s28  ;;  %s1211_s30 = scalar_lea.vmem (!%p146_p12), [#allocation2], %s835_s14 }
  0x4d   : > { %1018 = dma.done.wait (%p1133_p8), %s152_s19, 16384  }
  0x4e   : > { %1020 = vsyncadd (%p1133_p8), %s152_s19, 4294950912  ;;  %v188_v0 = vld [vmem:[%s1211_s30 + $0x8] sm:$0xff]  ;;  %v187_v1 = vld [vmem:[%s1211_s30] sm:$0xff]  ;;  %s1285_s20 = scalar_lea.vmem [#allocation5], %s835_s14  ;;  %s700_s2 = scalar_lea.sflag [#allocation4], %s1205_s28 }
  0x4f   : > { %347 = vxpose.xlu1.b32.start [1/16] %v188_v0, 128  ;;  %315 = vxpose.xlu0.b32.start [1/16] %v187_v1, 128  ;;  %v192_v2 = vld [vmem:[%s1211_s30 + $0x28] sm:$0xff]  ;;  %v191_v3 = vld [vmem:[%s1211_s30 + $0x20] sm:$0xff]  ;;  %v190_v32 = vld [vmem:[%s1211_s30 + $0x18] sm:$0xff]  ;;  %s838_s4 = sshll.u32 (%p1137_p9), %s1043_s10, 6 }
  0x50   : > { %v196_v4 = vld [vmem:[%s1211_s30 + $0x48] sm:$0xff]  ;;  %v195_v5 = vld [vmem:[%s1211_s30 + $0x40] sm:$0xff]  ;;  %v189_v33 = vld [vmem:[%s1211_s30 + $0x10] sm:$0xff]  ;;  %s709_s15 = ssub.s32 (%p1137_p9), 80, %s838_s4 }
  0x51   : > { %v200_v6 = vld [vmem:[%s1211_s30 + $0x68] sm:$0xff]  ;;  %v199_v7 = vld [vmem:[%s1211_s30 + $0x60] sm:$0xff]  ;;  %v194_v34 = vld [vmem:[%s1211_s30 + $0x38] sm:$0xff]  ;;  %p710_p8 = scmp.lt.s32.totalorder (%p1137_p9), %s709_s15, 64 }
  0x52   : > { %v204_v8 = vld [vmem:[%s1211_s30 + $0x88] sm:$0xff]  ;;  %v203_v9 = vld [vmem:[%s1211_s30 + $0x80] sm:$0xff]  ;;  %v193_v35 = vld [vmem:[%s1211_s30 + $0x30] sm:$0xff] }
  0x53   : > { %348 = vxpose.xlu1.b32.cont [2/16] %v192_v2, 128  ;;  %316 = vxpose.xlu0.b32.cont [2/16] %v191_v3, 128  ;;  %v208_v10 = vld [vmem:[%s1211_s30 + $0xa8] sm:$0xff]  ;;  %v207_v11 = vld [vmem:[%s1211_s30 + $0xa0] sm:$0xff]  ;;  %v198_v36 = vld [vmem:[%s1211_s30 + $0x58] sm:$0xff] }
  0x54   : > { %v212_v12 = vld [vmem:[%s1211_s30 + $0xc8] sm:$0xff]  ;;  %v211_v13 = vld [vmem:[%s1211_s30 + $0xc0] sm:$0xff]  ;;  %v197_v37 = vld [vmem:[%s1211_s30 + $0x50] sm:$0xff] }
  0x55   : > { %v216_v14 = vld [vmem:[%s1211_s30 + $0xe8] sm:$0xff]  ;;  %v215_v15 = vld [vmem:[%s1211_s30 + $0xe0] sm:$0xff]  ;;  %v202_v38 = vld [vmem:[%s1211_s30 + $0x78] sm:$0xff] }
  0x56   : > { %v220_v16 = vld [vmem:[%s1211_s30 + $0x108] sm:$0xff]  ;;  %v219_v17 = vld [vmem:[%s1211_s30 + $0x100] sm:$0xff]  ;;  %v201_v39 = vld [vmem:[%s1211_s30 + $0x70] sm:$0xff] }
  0x57   : > { %349 = vxpose.xlu1.b32.cont [3/16] %v196_v4, 128  ;;  %317 = vxpose.xlu0.b32.cont [3/16] %v195_v5, 128  ;;  %v224_v18 = vld [vmem:[%s1211_s30 + $0x128] sm:$0xff]  ;;  %v223_v19 = vld [vmem:[%s1211_s30 + $0x120] sm:$0xff]  ;;  %v206_v40 = vld [vmem:[%s1211_s30 + $0x98] sm:$0xff] }
  0x58   : > { %v228_v20 = vld [vmem:[%s1211_s30 + $0x148] sm:$0xff]  ;;  %v227_v21 = vld [vmem:[%s1211_s30 + $0x140] sm:$0xff]  ;;  %v205_v41 = vld [vmem:[%s1211_s30 + $0x90] sm:$0xff] }
  0x59   : > { %v232_v22 = vld [vmem:[%s1211_s30 + $0x168] sm:$0xff]  ;;  %v231_v23 = vld [vmem:[%s1211_s30 + $0x160] sm:$0xff]  ;;  %v210_v42 = vld [vmem:[%s1211_s30 + $0xb8] sm:$0xff] }
  0x5a   : > { %v236_v24 = vld [vmem:[%s1211_s30 + $0x188] sm:$0xff]  ;;  %v235_v25 = vld [vmem:[%s1211_s30 + $0x180] sm:$0xff]  ;;  %v209_v43 = vld [vmem:[%s1211_s30 + $0xb0] sm:$0xff] }
  0x5b   : > { %350 = vxpose.xlu1.b32.cont [4/16] %v200_v6, 128  ;;  %318 = vxpose.xlu0.b32.cont [4/16] %v199_v7, 128  ;;  %v240_v26 = vld [vmem:[%s1211_s30 + $0x1a8] sm:$0xff]  ;;  %v239_v27 = vld [vmem:[%s1211_s30 + $0x1a0] sm:$0xff]  ;;  %v214_v44 = vld [vmem:[%s1211_s30 + $0xd8] sm:$0xff] }
  0x5c   : > { %v244_v28 = vld [vmem:[%s1211_s30 + $0x1c8] sm:$0xff]  ;;  %v243_v29 = vld [vmem:[%s1211_s30 + $0x1c0] sm:$0xff]  ;;  %v213_v45 = vld [vmem:[%s1211_s30 + $0xd0] sm:$0xff] }
  0x5d   : > { %v248_v30 = vld [vmem:[%s1211_s30 + $0x1e8] sm:$0xff]  ;;  %v247_v31 = vld [vmem:[%s1211_s30 + $0x1e0] sm:$0xff]  ;;  %v218_v46 = vld [vmem:[%s1211_s30 + $0xf8] sm:$0xff] }
  0x5e   : > { %v217_v47 = vld [vmem:[%s1211_s30 + $0xf0] sm:$0xff]  ;;  %v222_v48 = vld [vmem:[%s1211_s30 + $0x118] sm:$0xff]  ;;  %v252_v0 = vld [vmem:[%s1211_s30 + $0x208] sm:$0xff] }
  0x5f   : > { %351 = vxpose.xlu1.b32.cont [5/16] %v204_v8, 128  ;;  %319 = vxpose.xlu0.b32.cont [5/16] %v203_v9, 128  ;;  %v221_v49 = vld [vmem:[%s1211_s30 + $0x110] sm:$0xff]  ;;  %v226_v50 = vld [vmem:[%s1211_s30 + $0x138] sm:$0xff]  ;;  %v251_v1 = vld [vmem:[%s1211_s30 + $0x200] sm:$0xff] }
  0x60   : > { %v225_v51 = vld [vmem:[%s1211_s30 + $0x130] sm:$0xff]  ;;  %v230_v52 = vld [vmem:[%s1211_s30 + $0x158] sm:$0xff]  ;;  %v256_v4 = vld [vmem:[%s1211_s30 + $0x228] sm:$0xff] }
  0x61   : > { %v229_v53 = vld [vmem:[%s1211_s30 + $0x150] sm:$0xff]  ;;  %v234_v54 = vld [vmem:[%s1211_s30 + $0x178] sm:$0xff]  ;;  %v255_v5 = vld [vmem:[%s1211_s30 + $0x220] sm:$0xff] }
  0x62   : > { %v233_v55 = vld [vmem:[%s1211_s30 + $0x170] sm:$0xff]  ;;  %v238_v56 = vld [vmem:[%s1211_s30 + $0x198] sm:$0xff]  ;;  %v260_v8 = vld [vmem:[%s1211_s30 + $0x248] sm:$0xff] }
  0x63   : > { %352 = vxpose.xlu1.b32.cont [6/16] %v208_v10, 128  ;;  %320 = vxpose.xlu0.b32.cont [6/16] %v207_v11, 128  ;;  %v237_v57 = vld [vmem:[%s1211_s30 + $0x190] sm:$0xff]  ;;  %v242_v58 = vld [vmem:[%s1211_s30 + $0x1b8] sm:$0xff]  ;;  %v259_v9 = vld [vmem:[%s1211_s30 + $0x240] sm:$0xff] }
  0x64   : > { %v241_v59 = vld [vmem:[%s1211_s30 + $0x1b0] sm:$0xff]  ;;  %v246_v60 = vld [vmem:[%s1211_s30 + $0x1d8] sm:$0xff] }
  0x65   : > { %v245_v61 = vld [vmem:[%s1211_s30 + $0x1d0] sm:$0xff]  ;;  %v250_v62 = vld [vmem:[%s1211_s30 + $0x1f8] sm:$0xff] }
  0x66   : > { %v249_v63 = vld [vmem:[%s1211_s30 + $0x1f0] sm:$0xff] }
  0x67   : > { %353 = vxpose.xlu1.b32.cont [7/16] %v212_v12, 128  ;;  %321 = vxpose.xlu0.b32.cont [7/16] %v211_v13, 128  ;;  %v264_v12 = vld [vmem:[%s1211_s30 + $0x268] sm:$0xff]  ;;  %v263_v13 = vld [vmem:[%s1211_s30 + $0x260] sm:$0xff] }
  0x6b   : > { %354 = vxpose.xlu1.b32.cont [8/16] %v216_v14, 128  ;;  %322 = vxpose.xlu0.b32.cont [8/16] %v215_v15, 128 }
  0x6f   : > { %355 = vxpose.xlu1.b32.cont [9/16] %v220_v16, 128  ;;  %323 = vxpose.xlu0.b32.cont [9/16] %v219_v17, 128  ;;  %v268_v16 = vld [vmem:[%s1211_s30 + $0x288] sm:$0xff]  ;;  %v267_v17 = vld [vmem:[%s1211_s30 + $0x280] sm:$0xff] }
  0x73   : > { %356 = vxpose.xlu1.b32.cont [10/16] %v224_v18, 128  ;;  %324 = vxpose.xlu0.b32.cont [10/16] %v223_v19, 128 }
  0x77   : > { %357 = vxpose.xlu1.b32.cont [11/16] %v228_v20, 128  ;;  %325 = vxpose.xlu0.b32.cont [11/16] %v227_v21, 128  ;;  %v272_v20 = vld [vmem:[%s1211_s30 + $0x2a8] sm:$0xff]  ;;  %v271_v21 = vld [vmem:[%s1211_s30 + $0x2a0] sm:$0xff] }
  0x7b   : > { %358 = vxpose.xlu1.b32.cont [12/16] %v232_v22, 128  ;;  %326 = vxpose.xlu0.b32.cont [12/16] %v231_v23, 128 }
  0x7f   : > { %359 = vxpose.xlu1.b32.cont [13/16] %v236_v24, 128  ;;  %327 = vxpose.xlu0.b32.cont [13/16] %v235_v25, 128  ;;  %v276_v24 = vld [vmem:[%s1211_s30 + $0x2c8] sm:$0xff]  ;;  %v275_v25 = vld [vmem:[%s1211_s30 + $0x2c0] sm:$0xff] }
  0x83   : > { %360 = vxpose.xlu1.b32.cont [14/16] %v240_v26, 128  ;;  %328 = vxpose.xlu0.b32.cont [14/16] %v239_v27, 128 }
  0x87   : > { %361 = vxpose.xlu1.b32.cont [15/16] %v244_v28, 128  ;;  %329 = vxpose.xlu0.b32.cont [15/16] %v243_v29, 128  ;;  %v280_v28 = vld [vmem:[%s1211_s30 + $0x2e8] sm:$0xff]  ;;  %v279_v29 = vld [vmem:[%s1211_s30 + $0x2e0] sm:$0xff] }
  0x8b   : > { %362 = vxpose.xlu1.b32.end [16/16] %v248_v30, 128  ;;  %330 = vxpose.xlu0.b32.end [16/16] %v247_v31, 128 }
  0x8f   : > { %411 = vxpose.xlu1.b32.start [1/16] %v190_v32, 128  ;;  %379 = vxpose.xlu0.b32.start [1/16] %v189_v33, 128  ;;  %v284_v32 = vld [vmem:[%s1211_s30 + $0x308] sm:$0xff]  ;;  %v283_v33 = vld [vmem:[%s1211_s30 + $0x300] sm:$0xff] }
  0x93   : > { %412 = vxpose.xlu1.b32.cont [2/16] %v194_v34, 128  ;;  %380 = vxpose.xlu0.b32.cont [2/16] %v193_v35, 128 }
  0x97   : > { %413 = vxpose.xlu1.b32.cont [3/16] %v198_v36, 128  ;;  %381 = vxpose.xlu0.b32.cont [3/16] %v197_v37, 128  ;;  %v288_v36 = vld [vmem:[%s1211_s30 + $0x328] sm:$0xff]  ;;  %v287_v37 = vld [vmem:[%s1211_s30 + $0x320] sm:$0xff] }
  0x9b   : > { %414 = vxpose.xlu1.b32.cont [4/16] %v202_v38, 128  ;;  %382 = vxpose.xlu0.b32.cont [4/16] %v201_v39, 128 }
  0x9f   : > { %415 = vxpose.xlu1.b32.cont [5/16] %v206_v40, 128  ;;  %383 = vxpose.xlu0.b32.cont [5/16] %v205_v41, 128  ;;  %v292_v40 = vld [vmem:[%s1211_s30 + $0x348] sm:$0xff]  ;;  %v291_v41 = vld [vmem:[%s1211_s30 + $0x340] sm:$0xff] }
  0xa3   : > { %416 = vxpose.xlu1.b32.cont [6/16] %v210_v42, 128  ;;  %384 = vxpose.xlu0.b32.cont [6/16] %v209_v43, 128 }
  0xa7   : > { %417 = vxpose.xlu1.b32.cont [7/16] %v214_v44, 128  ;;  %385 = vxpose.xlu0.b32.cont [7/16] %v213_v45, 128  ;;  %v296_v44 = vld [vmem:[%s1211_s30 + $0x368] sm:$0xff]  ;;  %v295_v45 = vld [vmem:[%s1211_s30 + $0x360] sm:$0xff] }
  0xab   : > { %418 = vxpose.xlu1.b32.cont [8/16] %v218_v46, 128  ;;  %386 = vxpose.xlu0.b32.cont [8/16] %v217_v47, 128 }
  0xaf   : > { %419 = vxpose.xlu1.b32.cont [9/16] %v222_v48, 128  ;;  %387 = vxpose.xlu0.b32.cont [9/16] %v221_v49, 128  ;;  %v300_v48 = vld [vmem:[%s1211_s30 + $0x388] sm:$0xff]  ;;  %v299_v49 = vld [vmem:[%s1211_s30 + $0x380] sm:$0xff] }
  0xb3   : > { %420 = vxpose.xlu1.b32.cont [10/16] %v226_v50, 128  ;;  %388 = vxpose.xlu0.b32.cont [10/16] %v225_v51, 128 }
  0xb7   : > { %421 = vxpose.xlu1.b32.cont [11/16] %v230_v52, 128  ;;  %389 = vxpose.xlu0.b32.cont [11/16] %v229_v53, 128  ;;  %v304_v52 = vld [vmem:[%s1211_s30 + $0x3a8] sm:$0xff]  ;;  %v303_v53 = vld [vmem:[%s1211_s30 + $0x3a0] sm:$0xff] }
  0xbb   : > { %422 = vxpose.xlu1.b32.cont [12/16] %v234_v54, 128  ;;  %390 = vxpose.xlu0.b32.cont [12/16] %v233_v55, 128 }
  0xbf   : > { %423 = vxpose.xlu1.b32.cont [13/16] %v238_v56, 128  ;;  %391 = vxpose.xlu0.b32.cont [13/16] %v237_v57, 128  ;;  %v308_v56 = vld [vmem:[%s1211_s30 + $0x3c8] sm:$0xff]  ;;  %v307_v57 = vld [vmem:[%s1211_s30 + $0x3c0] sm:$0xff] }
  0xc3   : > { %424 = vxpose.xlu1.b32.cont [14/16] %v242_v58, 128  ;;  %392 = vxpose.xlu0.b32.cont [14/16] %v241_v59, 128 }
  0xc7   : > { %425 = vxpose.xlu1.b32.cont [15/16] %v246_v60, 128  ;;  %393 = vxpose.xlu0.b32.cont [15/16] %v245_v61, 128  ;;  %v312_v60 = vld [vmem:[%s1211_s30 + $0x3e8] sm:$0xff]  ;;  %v311_v61 = vld [vmem:[%s1211_s30 + $0x3e0] sm:$0xff] }
  0xcb   : > { %426 = vxpose.xlu1.b32.end [16/16] %v250_v62, 128  ;;  %394 = vxpose.xlu0.b32.end [16/16] %v249_v63, 128 }
  0xcf   : > { %475 = vxpose.xlu1.b32.start [1/16] %v252_v0, 128  ;;  %v363_v2 = vpop.trf.xlu1  ;;  %443 = vxpose.xlu0.b32.start [1/16] %v251_v1, 128  ;;  %v331_v3 = vpop.trf.xlu0  ;;  %v254_v0 = vld [vmem:[%s1211_s30 + $0x218] sm:$0xff]  ;;  %v253_v1 = vld [vmem:[%s1211_s30 + $0x210] sm:$0xff] }
  0xd0   : > { %603 = vst [vmem:[%s1285_s20 + $0x100] sm:$0xff] %v363_v2  ;;  %571 = vst [vmem:[%s1285_s20] sm:$0xff] %v331_v3 }
  0xd3   : > { %476 = vxpose.xlu1.b32.cont [2/16] %v256_v4, 128  ;;  %v364_v6 = vpop.trf.xlu1  ;;  %444 = vxpose.xlu0.b32.cont [2/16] %v255_v5, 128  ;;  %v332_v7 = vpop.trf.xlu0  ;;  %v258_v4 = vld [vmem:[%s1211_s30 + $0x238] sm:$0xff]  ;;  %v257_v5 = vld [vmem:[%s1211_s30 + $0x230] sm:$0xff] }
  0xd4   : > { %605 = vst [vmem:[%s1285_s20 + $0x110] sm:$0xff] %v364_v6  ;;  %573 = vst [vmem:[%s1285_s20 + $0x10] sm:$0xff] %v332_v7 }
  0xd7   : > { %477 = vxpose.xlu1.b32.cont [3/16] %v260_v8, 128  ;;  %v365_v10 = vpop.trf.xlu1  ;;  %445 = vxpose.xlu0.b32.cont [3/16] %v259_v9, 128  ;;  %v333_v11 = vpop.trf.xlu0  ;;  %v262_v8 = vld [vmem:[%s1211_s30 + $0x258] sm:$0xff]  ;;  %v261_v9 = vld [vmem:[%s1211_s30 + $0x250] sm:$0xff] }
  0xd8   : > { %607 = vst [vmem:[%s1285_s20 + $0x120] sm:$0xff] %v365_v10  ;;  %575 = vst [vmem:[%s1285_s20 + $0x20] sm:$0xff] %v333_v11 }
  0xdb   : > { %478 = vxpose.xlu1.b32.cont [4/16] %v264_v12, 128  ;;  %v366_v14 = vpop.trf.xlu1  ;;  %446 = vxpose.xlu0.b32.cont [4/16] %v263_v13, 128  ;;  %v334_v15 = vpop.trf.xlu0  ;;  %v266_v12 = vld [vmem:[%s1211_s30 + $0x278] sm:$0xff]  ;;  %v265_v13 = vld [vmem:[%s1211_s30 + $0x270] sm:$0xff] }
  0xdc   : > { %609 = vst [vmem:[%s1285_s20 + $0x130] sm:$0xff] %v366_v14  ;;  %577 = vst [vmem:[%s1285_s20 + $0x30] sm:$0xff] %v334_v15 }
  0xdf   : > { %479 = vxpose.xlu1.b32.cont [5/16] %v268_v16, 128  ;;  %v367_v18 = vpop.trf.xlu1  ;;  %447 = vxpose.xlu0.b32.cont [5/16] %v267_v17, 128  ;;  %v335_v19 = vpop.trf.xlu0  ;;  %v270_v16 = vld [vmem:[%s1211_s30 + $0x298] sm:$0xff]  ;;  %v269_v17 = vld [vmem:[%s1211_s30 + $0x290] sm:$0xff] }
  0xe0   : > { %611 = vst [vmem:[%s1285_s20 + $0x140] sm:$0xff] %v367_v18  ;;  %579 = vst [vmem:[%s1285_s20 + $0x40] sm:$0xff] %v335_v19 }
  0xe3   : > { %480 = vxpose.xlu1.b32.cont [6/16] %v272_v20, 128  ;;  %v368_v22 = vpop.trf.xlu1  ;;  %448 = vxpose.xlu0.b32.cont [6/16] %v271_v21, 128  ;;  %v336_v23 = vpop.trf.xlu0  ;;  %v274_v20 = vld [vmem:[%s1211_s30 + $0x2b8] sm:$0xff]  ;;  %v273_v21 = vld [vmem:[%s1211_s30 + $0x2b0] sm:$0xff] }
  0xe4   : > { %613 = vst [vmem:[%s1285_s20 + $0x150] sm:$0xff] %v368_v22  ;;  %581 = vst [vmem:[%s1285_s20 + $0x50] sm:$0xff] %v336_v23 }
  0xe7   : > { %481 = vxpose.xlu1.b32.cont [7/16] %v276_v24, 128  ;;  %v369_v26 = vpop.trf.xlu1  ;;  %449 = vxpose.xlu0.b32.cont [7/16] %v275_v25, 128  ;;  %v337_v27 = vpop.trf.xlu0  ;;  %v278_v24 = vld [vmem:[%s1211_s30 + $0x2d8] sm:$0xff]  ;;  %v277_v25 = vld [vmem:[%s1211_s30 + $0x2d0] sm:$0xff] }
  0xe8   : > { %615 = vst [vmem:[%s1285_s20 + $0x160] sm:$0xff] %v369_v26  ;;  %583 = vst [vmem:[%s1285_s20 + $0x60] sm:$0xff] %v337_v27 }
  0xeb   : > { %482 = vxpose.xlu1.b32.cont [8/16] %v280_v28, 128  ;;  %v370_v30 = vpop.trf.xlu1  ;;  %450 = vxpose.xlu0.b32.cont [8/16] %v279_v29, 128  ;;  %v338_v31 = vpop.trf.xlu0  ;;  %v282_v28 = vld [vmem:[%s1211_s30 + $0x2f8] sm:$0xff]  ;;  %v281_v29 = vld [vmem:[%s1211_s30 + $0x2f0] sm:$0xff] }
  0xec   : > { %617 = vst [vmem:[%s1285_s20 + $0x170] sm:$0xff] %v370_v30  ;;  %585 = vst [vmem:[%s1285_s20 + $0x70] sm:$0xff] %v338_v31 }
  0xef   : > { %483 = vxpose.xlu1.b32.cont [9/16] %v284_v32, 128  ;;  %v371_v34 = vpop.trf.xlu1  ;;  %451 = vxpose.xlu0.b32.cont [9/16] %v283_v33, 128  ;;  %v339_v35 = vpop.trf.xlu0  ;;  %v286_v32 = vld [vmem:[%s1211_s30 + $0x318] sm:$0xff]  ;;  %v285_v33 = vld [vmem:[%s1211_s30 + $0x310] sm:$0xff] }
  0xf0   : > { %619 = vst [vmem:[%s1285_s20 + $0x180] sm:$0xff] %v371_v34  ;;  %587 = vst [vmem:[%s1285_s20 + $0x80] sm:$0xff] %v339_v35 }
  0xf3   : > { %484 = vxpose.xlu1.b32.cont [10/16] %v288_v36, 128  ;;  %v372_v38 = vpop.trf.xlu1  ;;  %452 = vxpose.xlu0.b32.cont [10/16] %v287_v37, 128  ;;  %v340_v39 = vpop.trf.xlu0  ;;  %v290_v36 = vld [vmem:[%s1211_s30 + $0x338] sm:$0xff]  ;;  %v289_v37 = vld [vmem:[%s1211_s30 + $0x330] sm:$0xff] }
  0xf4   : > { %621 = vst [vmem:[%s1285_s20 + $0x190] sm:$0xff] %v372_v38  ;;  %589 = vst [vmem:[%s1285_s20 + $0x90] sm:$0xff] %v340_v39 }
  0xf7   : > { %485 = vxpose.xlu1.b32.cont [11/16] %v292_v40, 128  ;;  %v373_v42 = vpop.trf.xlu1  ;;  %453 = vxpose.xlu0.b32.cont [11/16] %v291_v41, 128  ;;  %v341_v43 = vpop.trf.xlu0  ;;  %v294_v40 = vld [vmem:[%s1211_s30 + $0x358] sm:$0xff]  ;;  %v293_v41 = vld [vmem:[%s1211_s30 + $0x350] sm:$0xff] }
  0xf8   : > { %623 = vst [vmem:[%s1285_s20 + $0x1a0] sm:$0xff] %v373_v42  ;;  %591 = vst [vmem:[%s1285_s20 + $0xa0] sm:$0xff] %v341_v43 }
  0xfb   : > { %486 = vxpose.xlu1.b32.cont [12/16] %v296_v44, 128  ;;  %v374_v46 = vpop.trf.xlu1  ;;  %454 = vxpose.xlu0.b32.cont [12/16] %v295_v45, 128  ;;  %v342_v47 = vpop.trf.xlu0  ;;  %v298_v44 = vld [vmem:[%s1211_s30 + $0x378] sm:$0xff]  ;;  %v297_v45 = vld [vmem:[%s1211_s30 + $0x370] sm:$0xff] }
  0xfc   : > { %625 = vst [vmem:[%s1285_s20 + $0x1b0] sm:$0xff] %v374_v46  ;;  %593 = vst [vmem:[%s1285_s20 + $0xb0] sm:$0xff] %v342_v47 }
  0xff   : > { %487 = vxpose.xlu1.b32.cont [13/16] %v300_v48, 128  ;;  %v375_v50 = vpop.trf.xlu1  ;;  %455 = vxpose.xlu0.b32.cont [13/16] %v299_v49, 128  ;;  %v343_v51 = vpop.trf.xlu0  ;;  %v302_v48 = vld [vmem:[%s1211_s30 + $0x398] sm:$0xff]  ;;  %v301_v49 = vld [vmem:[%s1211_s30 + $0x390] sm:$0xff] }
 0x100   : > { %627 = vst [vmem:[%s1285_s20 + $0x1c0] sm:$0xff] %v375_v50  ;;  %595 = vst [vmem:[%s1285_s20 + $0xc0] sm:$0xff] %v343_v51 }
 0x103   : > { %488 = vxpose.xlu1.b32.cont [14/16] %v304_v52, 128  ;;  %v376_v54 = vpop.trf.xlu1  ;;  %456 = vxpose.xlu0.b32.cont [14/16] %v303_v53, 128  ;;  %v344_v55 = vpop.trf.xlu0  ;;  %v306_v52 = vld [vmem:[%s1211_s30 + $0x3b8] sm:$0xff]  ;;  %v305_v53 = vld [vmem:[%s1211_s30 + $0x3b0] sm:$0xff] }
 0x104   : > { %629 = vst [vmem:[%s1285_s20 + $0x1d0] sm:$0xff] %v376_v54  ;;  %597 = vst [vmem:[%s1285_s20 + $0xd0] sm:$0xff] %v344_v55 }
 0x107   : > { %489 = vxpose.xlu1.b32.cont [15/16] %v308_v56, 128  ;;  %v377_v58 = vpop.trf.xlu1  ;;  %457 = vxpose.xlu0.b32.cont [15/16] %v307_v57, 128  ;;  %v345_v59 = vpop.trf.xlu0  ;;  %v310_v56 = vld [vmem:[%s1211_s30 + $0x3d8] sm:$0xff]  ;;  %v309_v57 = vld [vmem:[%s1211_s30 + $0x3d0] sm:$0xff] }
 0x108   : > { %631 = vst [vmem:[%s1285_s20 + $0x1e0] sm:$0xff] %v377_v58  ;;  %599 = vst [vmem:[%s1285_s20 + $0xe0] sm:$0xff] %v345_v59 }
 0x10b   : > { %490 = vxpose.xlu1.b32.end [16/16] %v312_v60, 128  ;;  %v378_v62 = vpop.trf.xlu1  ;;  %458 = vxpose.xlu0.b32.end [16/16] %v311_v61, 128  ;;  %v346_v63 = vpop.trf.xlu0  ;;  %v314_v60 = vld [vmem:[%s1211_s30 + $0x3f8] sm:$0xff]  ;;  %v313_v61 = vld [vmem:[%s1211_s30 + $0x3f0] sm:$0xff] }
 0x10c   : > { %633 = vst [vmem:[%s1285_s20 + $0x1f0] sm:$0xff] %v378_v62  ;;  %601 = vst [vmem:[%s1285_s20 + $0xf0] sm:$0xff] %v346_v63 }
 0x10f   : > { %539 = vxpose.xlu1.b32.start [1/16] %v254_v0, 128  ;;  %v427_v2 = vpop.trf.xlu1  ;;  %507 = vxpose.xlu0.b32.start [1/16] %v253_v1, 128  ;;  %v395_v3 = vpop.trf.xlu0 }
 0x110   : > { %667 = vst [vmem:[%s1285_s20 + $0x300] sm:$0xff] %v427_v2  ;;  %635 = vst [vmem:[%s1285_s20 + $0x200] sm:$0xff] %v395_v3 }
 0x113   : > { %540 = vxpose.xlu1.b32.cont [2/16] %v258_v4, 128  ;;  %v428_v6 = vpop.trf.xlu1  ;;  %508 = vxpose.xlu0.b32.cont [2/16] %v257_v5, 128  ;;  %v396_v7 = vpop.trf.xlu0 }
 0x114   : > { %669 = vst [vmem:[%s1285_s20 + $0x310] sm:$0xff] %v428_v6  ;;  %637 = vst [vmem:[%s1285_s20 + $0x210] sm:$0xff] %v396_v7 }
 0x117   : > { %541 = vxpose.xlu1.b32.cont [3/16] %v262_v8, 128  ;;  %v429_v10 = vpop.trf.xlu1  ;;  %509 = vxpose.xlu0.b32.cont [3/16] %v261_v9, 128  ;;  %v397_v11 = vpop.trf.xlu0 }
 0x118   : > { %671 = vst [vmem:[%s1285_s20 + $0x320] sm:$0xff] %v429_v10  ;;  %639 = vst [vmem:[%s1285_s20 + $0x220] sm:$0xff] %v397_v11 }
 0x11b   : > { %542 = vxpose.xlu1.b32.cont [4/16] %v266_v12, 128  ;;  %v430_v14 = vpop.trf.xlu1  ;;  %510 = vxpose.xlu0.b32.cont [4/16] %v265_v13, 128  ;;  %v398_v15 = vpop.trf.xlu0 }
 0x11c   : > { %673 = vst [vmem:[%s1285_s20 + $0x330] sm:$0xff] %v430_v14  ;;  %641 = vst [vmem:[%s1285_s20 + $0x230] sm:$0xff] %v398_v15 }
 0x11f   : > { %543 = vxpose.xlu1.b32.cont [5/16] %v270_v16, 128  ;;  %v431_v18 = vpop.trf.xlu1  ;;  %511 = vxpose.xlu0.b32.cont [5/16] %v269_v17, 128  ;;  %v399_v19 = vpop.trf.xlu0 }
 0x120   : > { %675 = vst [vmem:[%s1285_s20 + $0x340] sm:$0xff] %v431_v18  ;;  %643 = vst [vmem:[%s1285_s20 + $0x240] sm:$0xff] %v399_v19 }
 0x123   : > { %544 = vxpose.xlu1.b32.cont [6/16] %v274_v20, 128  ;;  %v432_v22 = vpop.trf.xlu1  ;;  %512 = vxpose.xlu0.b32.cont [6/16] %v273_v21, 128  ;;  %v400_v23 = vpop.trf.xlu0 }
 0x124   : > { %677 = vst [vmem:[%s1285_s20 + $0x350] sm:$0xff] %v432_v22  ;;  %645 = vst [vmem:[%s1285_s20 + $0x250] sm:$0xff] %v400_v23 }
 0x127   : > { %545 = vxpose.xlu1.b32.cont [7/16] %v278_v24, 128  ;;  %v433_v26 = vpop.trf.xlu1  ;;  %513 = vxpose.xlu0.b32.cont [7/16] %v277_v25, 128  ;;  %v401_v27 = vpop.trf.xlu0 }
 0x128   : > { %679 = vst [vmem:[%s1285_s20 + $0x360] sm:$0xff] %v433_v26  ;;  %647 = vst [vmem:[%s1285_s20 + $0x260] sm:$0xff] %v401_v27 }
 0x12b   : > { %546 = vxpose.xlu1.b32.cont [8/16] %v282_v28, 128  ;;  %v434_v30 = vpop.trf.xlu1  ;;  %514 = vxpose.xlu0.b32.cont [8/16] %v281_v29, 128  ;;  %v402_v31 = vpop.trf.xlu0 }
 0x12c   : > { %681 = vst [vmem:[%s1285_s20 + $0x370] sm:$0xff] %v434_v30  ;;  %649 = vst [vmem:[%s1285_s20 + $0x270] sm:$0xff] %v402_v31 }
 0x12f   : > { %547 = vxpose.xlu1.b32.cont [9/16] %v286_v32, 128  ;;  %v435_v34 = vpop.trf.xlu1  ;;  %515 = vxpose.xlu0.b32.cont [9/16] %v285_v33, 128  ;;  %v403_v35 = vpop.trf.xlu0 }
 0x130   : > { %683 = vst [vmem:[%s1285_s20 + $0x380] sm:$0xff] %v435_v34  ;;  %651 = vst [vmem:[%s1285_s20 + $0x280] sm:$0xff] %v403_v35 }
 0x133   : > { %548 = vxpose.xlu1.b32.cont [10/16] %v290_v36, 128  ;;  %v436_v38 = vpop.trf.xlu1  ;;  %516 = vxpose.xlu0.b32.cont [10/16] %v289_v37, 128  ;;  %v404_v39 = vpop.trf.xlu0 }
 0x134   : > { %685 = vst [vmem:[%s1285_s20 + $0x390] sm:$0xff] %v436_v38  ;;  %653 = vst [vmem:[%s1285_s20 + $0x290] sm:$0xff] %v404_v39 }
 0x137   : > { %549 = vxpose.xlu1.b32.cont [11/16] %v294_v40, 128  ;;  %v437_v42 = vpop.trf.xlu1  ;;  %517 = vxpose.xlu0.b32.cont [11/16] %v293_v41, 128  ;;  %v405_v43 = vpop.trf.xlu0 }
 0x138   : > { %687 = vst [vmem:[%s1285_s20 + $0x3a0] sm:$0xff] %v437_v42  ;;  %655 = vst [vmem:[%s1285_s20 + $0x2a0] sm:$0xff] %v405_v43 }
 0x13b   : > { %550 = vxpose.xlu1.b32.cont [12/16] %v298_v44, 128  ;;  %v438_v46 = vpop.trf.xlu1  ;;  %518 = vxpose.xlu0.b32.cont [12/16] %v297_v45, 128  ;;  %v406_v47 = vpop.trf.xlu0 }
 0x13c   : > { %689 = vst [vmem:[%s1285_s20 + $0x3b0] sm:$0xff] %v438_v46  ;;  %657 = vst [vmem:[%s1285_s20 + $0x2b0] sm:$0xff] %v406_v47 }
 0x13f   : > { %551 = vxpose.xlu1.b32.cont [13/16] %v302_v48, 128  ;;  %v439_v50 = vpop.trf.xlu1  ;;  %519 = vxpose.xlu0.b32.cont [13/16] %v301_v49, 128  ;;  %v407_v51 = vpop.trf.xlu0 }
 0x140   : > { %691 = vst [vmem:[%s1285_s20 + $0x3c0] sm:$0xff] %v439_v50  ;;  %659 = vst [vmem:[%s1285_s20 + $0x2c0] sm:$0xff] %v407_v51 }
 0x143   : > { %552 = vxpose.xlu1.b32.cont [14/16] %v306_v52, 128  ;;  %v440_v54 = vpop.trf.xlu1  ;;  %520 = vxpose.xlu0.b32.cont [14/16] %v305_v53, 128  ;;  %v408_v55 = vpop.trf.xlu0 }
 0x144   : > { %693 = vst [vmem:[%s1285_s20 + $0x3d0] sm:$0xff] %v440_v54  ;;  %661 = vst [vmem:[%s1285_s20 + $0x2d0] sm:$0xff] %v408_v55 }
 0x147   : > { %553 = vxpose.xlu1.b32.cont [15/16] %v310_v56, 128  ;;  %v441_v58 = vpop.trf.xlu1  ;;  %521 = vxpose.xlu0.b32.cont [15/16] %v309_v57, 128  ;;  %v409_v59 = vpop.trf.xlu0 }
 0x148   : > { %695 = vst [vmem:[%s1285_s20 + $0x3e0] sm:$0xff] %v441_v58  ;;  %663 = vst [vmem:[%s1285_s20 + $0x2e0] sm:$0xff] %v409_v59 }
 0x14b   : > { %554 = vxpose.xlu1.b32.end [16/16] %v314_v60, 128  ;;  %v442_v62 = vpop.trf.xlu1  ;;  %522 = vxpose.xlu0.b32.end [16/16] %v313_v61, 128  ;;  %v410_v63 = vpop.trf.xlu0 }
 0x14c   : > { %697 = vst [vmem:[%s1285_s20 + $0x3f0] sm:$0xff] %v442_v62  ;;  %665 = vst [vmem:[%s1285_s20 + $0x2f0] sm:$0xff] %v410_v63 }
 0x14f   : > { %v491_v0 = vpop.trf.xlu1  ;;  %v459_v1 = vpop.trf.xlu0 }
 0x150   : > { %604 = vst [vmem:[%s1285_s20 + $0x108] sm:$0xff] %v491_v0  ;;  %572 = vst [vmem:[%s1285_s20 + $0x8] sm:$0xff] %v459_v1 }
 0x153   : > { %v492_v2 = vpop.trf.xlu1  ;;  %v460_v3 = vpop.trf.xlu0 }
 0x154   : > { %606 = vst [vmem:[%s1285_s20 + $0x118] sm:$0xff] %v492_v2  ;;  %574 = vst [vmem:[%s1285_s20 + $0x18] sm:$0xff] %v460_v3 }
 0x157   : > { %v493_v4 = vpop.trf.xlu1  ;;  %v461_v5 = vpop.trf.xlu0 }
 0x158   : > { %608 = vst [vmem:[%s1285_s20 + $0x128] sm:$0xff] %v493_v4  ;;  %576 = vst [vmem:[%s1285_s20 + $0x28] sm:$0xff] %v461_v5 }
 0x15b   : > { %v494_v6 = vpop.trf.xlu1  ;;  %v462_v7 = vpop.trf.xlu0 }
 0x15c   : > { %610 = vst [vmem:[%s1285_s20 + $0x138] sm:$0xff] %v494_v6  ;;  %578 = vst [vmem:[%s1285_s20 + $0x38] sm:$0xff] %v462_v7 }
 0x15f   : > { %v495_v8 = vpop.trf.xlu1  ;;  %v463_v9 = vpop.trf.xlu0 }
 0x160   : > { %612 = vst [vmem:[%s1285_s20 + $0x148] sm:$0xff] %v495_v8  ;;  %580 = vst [vmem:[%s1285_s20 + $0x48] sm:$0xff] %v463_v9 }
 0x163   : > { %v496_v10 = vpop.trf.xlu1  ;;  %v464_v11 = vpop.trf.xlu0 }
 0x164   : > { %614 = vst [vmem:[%s1285_s20 + $0x158] sm:$0xff] %v496_v10  ;;  %582 = vst [vmem:[%s1285_s20 + $0x58] sm:$0xff] %v464_v11 }
 0x167   : > { %v497_v12 = vpop.trf.xlu1  ;;  %v465_v13 = vpop.trf.xlu0 }
 0x168   : > { %616 = vst [vmem:[%s1285_s20 + $0x168] sm:$0xff] %v497_v12  ;;  %584 = vst [vmem:[%s1285_s20 + $0x68] sm:$0xff] %v465_v13 }
 0x16b   : > { %v498_v14 = vpop.trf.xlu1  ;;  %v466_v15 = vpop.trf.xlu0 }
 0x16c   : > { %618 = vst [vmem:[%s1285_s20 + $0x178] sm:$0xff] %v498_v14  ;;  %586 = vst [vmem:[%s1285_s20 + $0x78] sm:$0xff] %v466_v15 }
 0x16f   : > { %v499_v16 = vpop.trf.xlu1  ;;  %v467_v17 = vpop.trf.xlu0 }
 0x170   : > { %620 = vst [vmem:[%s1285_s20 + $0x188] sm:$0xff] %v499_v16  ;;  %588 = vst [vmem:[%s1285_s20 + $0x88] sm:$0xff] %v467_v17 }
 0x173   : > { %v500_v18 = vpop.trf.xlu1  ;;  %v468_v19 = vpop.trf.xlu0 }
 0x174   : > { %622 = vst [vmem:[%s1285_s20 + $0x198] sm:$0xff] %v500_v18  ;;  %590 = vst [vmem:[%s1285_s20 + $0x98] sm:$0xff] %v468_v19 }
 0x177   : > { %v501_v20 = vpop.trf.xlu1  ;;  %v469_v21 = vpop.trf.xlu0 }
 0x178   : > { %624 = vst [vmem:[%s1285_s20 + $0x1a8] sm:$0xff] %v501_v20  ;;  %592 = vst [vmem:[%s1285_s20 + $0xa8] sm:$0xff] %v469_v21 }
 0x17b   : > { %v502_v22 = vpop.trf.xlu1  ;;  %v470_v23 = vpop.trf.xlu0 }
 0x17c   : > { %626 = vst [vmem:[%s1285_s20 + $0x1b8] sm:$0xff] %v502_v22  ;;  %594 = vst [vmem:[%s1285_s20 + $0xb8] sm:$0xff] %v470_v23 }
 0x17f   : > { %v503_v24 = vpop.trf.xlu1  ;;  %v471_v25 = vpop.trf.xlu0 }
 0x180   : > { %628 = vst [vmem:[%s1285_s20 + $0x1c8] sm:$0xff] %v503_v24  ;;  %596 = vst [vmem:[%s1285_s20 + $0xc8] sm:$0xff] %v471_v25 }
 0x183   : > { %v504_v26 = vpop.trf.xlu1  ;;  %v472_v27 = vpop.trf.xlu0 }
 0x184   : > { %630 = vst [vmem:[%s1285_s20 + $0x1d8] sm:$0xff] %v504_v26  ;;  %598 = vst [vmem:[%s1285_s20 + $0xd8] sm:$0xff] %v472_v27 }
 0x187   : > { %v505_v28 = vpop.trf.xlu1  ;;  %v473_v29 = vpop.trf.xlu0 }
 0x188   : > { %632 = vst [vmem:[%s1285_s20 + $0x1e8] sm:$0xff] %v505_v28  ;;  %600 = vst [vmem:[%s1285_s20 + $0xe8] sm:$0xff] %v473_v29 }
 0x18b   : > { %v506_v30 = vpop.trf.xlu1  ;;  %v474_v31 = vpop.trf.xlu0 }
 0x18c   : > { %634 = vst [vmem:[%s1285_s20 + $0x1f8] sm:$0xff] %v506_v30  ;;  %602 = vst [vmem:[%s1285_s20 + $0xf8] sm:$0xff] %v474_v31 }
 0x18f   : > { %v555_v32 = vpop.trf.xlu1  ;;  %v523_v33 = vpop.trf.xlu0 }
 0x190   : > { %668 = vst [vmem:[%s1285_s20 + $0x308] sm:$0xff] %v555_v32  ;;  %636 = vst [vmem:[%s1285_s20 + $0x208] sm:$0xff] %v523_v33 }
 0x193   : > { %v556_v34 = vpop.trf.xlu1  ;;  %v524_v35 = vpop.trf.xlu0 }
 0x194   : > { %670 = vst [vmem:[%s1285_s20 + $0x318] sm:$0xff] %v556_v34  ;;  %638 = vst [vmem:[%s1285_s20 + $0x218] sm:$0xff] %v524_v35 }
 0x197   : > { %v557_v36 = vpop.trf.xlu1  ;;  %v525_v37 = vpop.trf.xlu0 }
 0x198   : > { %672 = vst [vmem:[%s1285_s20 + $0x328] sm:$0xff] %v557_v36  ;;  %640 = vst [vmem:[%s1285_s20 + $0x228] sm:$0xff] %v525_v37 }
 0x19b   : > { %v558_v38 = vpop.trf.xlu1  ;;  %v526_v39 = vpop.trf.xlu0 }
 0x19c   : > { %674 = vst [vmem:[%s1285_s20 + $0x338] sm:$0xff] %v558_v38  ;;  %642 = vst [vmem:[%s1285_s20 + $0x238] sm:$0xff] %v526_v39 }
 0x19f   : > { %v559_v40 = vpop.trf.xlu1  ;;  %v527_v41 = vpop.trf.xlu0 }
 0x1a0   : > { %676 = vst [vmem:[%s1285_s20 + $0x348] sm:$0xff] %v559_v40  ;;  %644 = vst [vmem:[%s1285_s20 + $0x248] sm:$0xff] %v527_v41 }
 0x1a3   : > { %v560_v42 = vpop.trf.xlu1  ;;  %v528_v43 = vpop.trf.xlu0 }
 0x1a4   : > { %678 = vst [vmem:[%s1285_s20 + $0x358] sm:$0xff] %v560_v42  ;;  %646 = vst [vmem:[%s1285_s20 + $0x258] sm:$0xff] %v528_v43 }
 0x1a7   : > { %v561_v44 = vpop.trf.xlu1  ;;  %v529_v45 = vpop.trf.xlu0 }
 0x1a8   : > { %680 = vst [vmem:[%s1285_s20 + $0x368] sm:$0xff] %v561_v44  ;;  %648 = vst [vmem:[%s1285_s20 + $0x268] sm:$0xff] %v529_v45 }
 0x1ab   : > { %v562_v46 = vpop.trf.xlu1  ;;  %v530_v47 = vpop.trf.xlu0 }
 0x1ac   : > { %682 = vst [vmem:[%s1285_s20 + $0x378] sm:$0xff] %v562_v46  ;;  %650 = vst [vmem:[%s1285_s20 + $0x278] sm:$0xff] %v530_v47 }
 0x1af   : > { %v563_v48 = vpop.trf.xlu1  ;;  %v531_v49 = vpop.trf.xlu0 }
 0x1b0   : > { %684 = vst [vmem:[%s1285_s20 + $0x388] sm:$0xff] %v563_v48  ;;  %652 = vst [vmem:[%s1285_s20 + $0x288] sm:$0xff] %v531_v49 }
 0x1b3   : > { %v564_v50 = vpop.trf.xlu1  ;;  %v532_v51 = vpop.trf.xlu0 }
 0x1b4   : > { %686 = vst [vmem:[%s1285_s20 + $0x398] sm:$0xff] %v564_v50  ;;  %654 = vst [vmem:[%s1285_s20 + $0x298] sm:$0xff] %v532_v51 }
 0x1b7   : > { %v565_v52 = vpop.trf.xlu1  ;;  %v533_v53 = vpop.trf.xlu0 }
 0x1b8   : > { %688 = vst [vmem:[%s1285_s20 + $0x3a8] sm:$0xff] %v565_v52  ;;  %656 = vst [vmem:[%s1285_s20 + $0x2a8] sm:$0xff] %v533_v53 }
 0x1bb   : > { %v566_v54 = vpop.trf.xlu1  ;;  %v534_v55 = vpop.trf.xlu0 }
 0x1bc   : > { %690 = vst [vmem:[%s1285_s20 + $0x3b8] sm:$0xff] %v566_v54  ;;  %658 = vst [vmem:[%s1285_s20 + $0x2b8] sm:$0xff] %v534_v55 }
 0x1bf   : > { %v567_v56 = vpop.trf.xlu1  ;;  %v535_v57 = vpop.trf.xlu0 }
 0x1c0   : > { %692 = vst [vmem:[%s1285_s20 + $0x3c8] sm:$0xff] %v567_v56  ;;  %660 = vst [vmem:[%s1285_s20 + $0x2c8] sm:$0xff] %v535_v57 }
 0x1c3   : > { %v568_v58 = vpop.trf.xlu1  ;;  %v536_v59 = vpop.trf.xlu0 }
 0x1c4   : > { %694 = vst [vmem:[%s1285_s20 + $0x3d8] sm:$0xff] %v568_v58  ;;  %662 = vst [vmem:[%s1285_s20 + $0x2d8] sm:$0xff] %v536_v59 }
 0x1c6   : > { %706 = sbr.rel (!%p1137_p9) target bundleno = 491 (0x1eb), region = 32 }
 0x1c7   : > { %v569_v60 = vpop.trf.xlu1  ;;  %v537_v61 = vpop.trf.xlu0 }
 0x1c8   : > { %696 = vst [vmem:[%s1285_s20 + $0x3e8] sm:$0xff] %v569_v60  ;;  %664 = vst [vmem:[%s1285_s20 + $0x2e8] sm:$0xff] %v537_v61 }
 0x1cb   : > { %v570_v62 = vpop.trf.xlu1  ;;  %v538_v63 = vpop.trf.xlu0 }
 0x1cc   : > { %698 = vst [vmem:[%s1285_s20 + $0x3f8] sm:$0xff] %v570_v62  ;;  %666 = vst [vmem:[%s1285_s20 + $0x2f8] sm:$0xff] %v538_v63 }
 0x1cd   : > { %s1574_s15 = smov (!%p710_p8, %s709_s15), 64 }
 0x1ce   : > { %s1481_s18 = sshll.u32 %s1574_s15, 8 }
 0x1cf   : > { %s715_s27 = ssub.s32 16384, %s1481_s18 }
 0x1d0   : > { %716 = vsyncadd %s700_s2, %s715_s27  ;;  %p841_p1 = scmp.ne.s32.totalorder %s1481_s18, 0  ;;  %s851_s21 = sshll.u32 %s1043_s10, 7 }
 0x1d1   : > { %s853_s22 = smul.u32 160, %s1039_s9  ;;  %s725_s23 = sshll.u32 %s1285_s20, 4  ;;  %s1490_s23 = int_to_ptr.vmem [resolvable:$true] %s725_s23 }
 0x1d2   : > { %s957_s19 = scalar_lea.vmem %s1490_s23, %s1481_s18  ;;  %s1060_s10 = smov [#allocation5]  }
 0x1d3   : > { %s721_s24 = sadd.s32 %s853_s22, %s851_s21  ;;  %p958_p9 = scmp.ne.s32.totalorder %s1490_s23, %s957_s19 }
 0x1d4   : > { %s843_s3 = sshll.u32 %s721_s24, 7  ;;  %s961_s9 = sshll.u32 %s1060_s10, 4  ;;  %s962_s9 = int_to_ptr.vmem [resolvable:$false] %s961_s9 }
 0x1d5   : > { %s1495_s14 = scalar_lea.hbm %s1552_s1, %s843_s3  ;;  %p959_p11 = pnand %p958_p9, %p841_p1 }
 0x1d6   : > { %s963_s30 = scalar_lea.vmem %s962_s9, 32768  ;;  %p964_p0 = scmp.lt.s32.totalorder %s1490_s23, %s962_s9 }
 0x1d7   : > { %p960_p13 = pneg %p959_p11  ;;  %p965_p2 = scmp.lt.s32.totalorder %s963_s30, %s957_s19 }
 0x1d9   : > { %p966_p3 = por %p965_p2, %p964_p0 }
 0x1db   : > { %p967_p5 = pnand %p966_p3, %p960_p13 }
 0x1dd   : > { %970 = shalt.err (!%p967_p5)
}
 0x1de   : > { %s971_s20 = scalar_lea.hbm %s1495_s14, %s1481_s18  ;;  %s975_s27 = scalar_lea.hbm %s1552_s1, 40960 }
 0x1df   : > { %p972_p6 = scmp.ne.s32.totalorder %s1495_s14, %s971_s20  ;;  %p976_p10 = scmp.lt.u32.totalorder %s1495_s14, %s1552_s1 }
 0x1e0   : > { %p977_p12 = scmp.lt.u32.totalorder %s975_s27, %s971_s20  ;;  %p979_p9 = scmp.lt.u32.totalorder %s971_s20, %s1495_s14 }
 0x1e1   : > { %p973_p7 = pnand %p972_p6, %p841_p1 }
 0x1e2   : > { %p978_p8 = por %p977_p12, %p976_p10 }
 0x1e3   : > { %p974_p4 = pneg %p973_p7 }
 0x1e4   : > { %p980_p11 = por %p979_p9, %p978_p8 }
 0x1e6   : > { %p981_p13 = pnand %p980_p11, %p974_p4 }
 0x1e8   : > { %984 = shalt.err (!%p981_p13)
}
 0x1e9   : > { %s1061_s24 = smov 256   ;;  %s1062_s3 = smov 16  }
 0x1ea   : > { %731 = dma.vmem_to_hbm [thread:$0]  (%p841_p1), %s1490_s23, %s1481_s18, %s1495_s14, %s700_s2, %s1061_s24, %s1061_s24, %s1062_s3  }
 0x1eb PF: > { %p860_p0 = scmp.ge.s32.totalorder %s1055_s13, 2  ;;  %s740_s29 = sand.u32 1, %s1027_s6  }
 0x1ec   : > { %p1557_p2 = scmp.ne.s32.totalorder %s1556_s25, 0  ;;  %s741_s5 = scalar_lea.sflag [#allocation4], %s740_s29 }
 0x1ee   : > { %p857_p3 = pnand %p860_p0, %p1557_p2 }
 0x1f0   : > { %1022 = dma.done.wait (!%p857_p3), %s741_s5, 16384  }
 0x1f1   : > { %1024 = vsyncadd (!%p857_p3), %s741_s5, 4294950912  ;;  %s17_s13 = sadd.s32 1, %s1055_s13   ;;  %s1558_s6 = smov %s1031_s7 }
 0x1f2   : > { %p14_p5 = scmp.ge.s32.totalorder %s17_s13, 6   ;;  %s1559_s7 = smov %s1035_s8 }
 0x1f3   : > { %s1560_s8 = smov %s1149_s26  ;;  %s1561_s9 = smov %s1047_s11 }
 0x1f4   : > { %s1562_s10 = smov %s1051_s12  ;;  %s1563_s11 = smov %s1566_s16 }
 0x1f5   : > { %s1564_s12 = smov %s1570_s17  ;;  %16 = sbr.rel (!%p14_p5) target bundleno = 7 (0x7), region = 69 }
 0x1fc   :  { %746 = vsyncpa [#allocation3], 1 }
 0x1fd   :  { %748 = vsyncpa [#allocation3 + $0x1], 1 }
 0x1fe   :  { %749 = vsyncpa [#allocation4], 1 }
 0x1ff   :  { %751 = vsyncpa [#allocation4 + $0x1], 1 }

</bundles_post_ra>
